<compile_context>
chip_gen: v5e
topology: v5e:2x2
jax: 0.10.0
libtpu: 0.0.40
codegen_flags: <defaults>
</compile_context>

<pallas_src>
import functools
import math

import jax
import jax.numpy as jnp
from jax import lax
from jax.experimental import pallas as pl
from jax.experimental.pallas import tpu as pltpu


# ----------------------------------------------------------------------------
# Fused kernel: logits = x_flat @ A_T^T (accumulated over K tiles), then
# z = (logits + fc_bias + gumbel) / tau  ->  hard gumbel-softmax epilogue.
# ----------------------------------------------------------------------------
def _gating_kernel(x_ref, a_ref, bg_ref, o_ref, acc_ref, *, inv_tau):
    # x_ref:  (B, tk)   NCHW-flattened input tile
    # a_ref:  (R, tk)   folded (conv ∘ fc) weight tile
    # bg_ref: (B, R)    fc bias + gumbel noise (pre-added in wrapper)
    # acc_ref:(B, R)    f32 logits accumulator (VMEM scratch)
    k = pl.program_id(0)

    @pl.when(k == 0)
    def _():
        acc_ref[...] = jnp.zeros_like(acc_ref)

    acc_ref[...] += lax.dot_general(
        x_ref[...], a_ref[...],
        dimension_numbers=(((1,), (1,)), ((), ())),
        preferred_element_type=jnp.float32)          # (B, R)

    @pl.when(k == pl.num_programs(0) - 1)
    def _():
        z = (acc_ref[...] + bg_ref[...]) * inv_tau

        # numerically-stable softmax (denominator reciprocal on the EUP)
        zmax = jnp.max(z, axis=-1, keepdims=True)
        e = jnp.exp(z - zmax)
        soft = e * pl.reciprocal(jnp.sum(e, axis=-1, keepdims=True), approx=True)

        # hard one-hot at argmax (first occurrence on ties), straight-through fwd
        col = lax.broadcasted_iota(jnp.int32, z.shape, 1)
        idx = jnp.min(jnp.where(z == zmax, col, z.shape[-1]),
                      axis=-1, keepdims=True)
        hard = (col == idx).astype(jnp.float32)

        o_ref[...] = (hard - soft + soft).astype(o_ref.dtype)


def _choose_tk(K, max_tk):
    """Largest K-tile: full K if it fits, else the biggest divisor of K that is
    a multiple of 128 and <= max_tk (keeps the (8,128) BlockSpec rule)."""
    if K <= max_tk:
        return K
    start = max_tk - (max_tk % 128)
    for d in range(start, 0, -128):
        if K % d == 0:
            return d
    return K  # fallback: single block


def gating_logits_gumbel(x_flat, a_t, bias_plus_gumbel, *, tau=1.0,
                         max_block_k=32768):
    B, K = x_flat.shape
    R = a_t.shape[0]
    tk = _choose_tk(K, max_block_k)
    nk = K // tk
    kernel = functools.partial(_gating_kernel, inv_tau=1.0 / tau)
    return pl.pallas_call(
        kernel,
        out_shape=jax.ShapeDtypeStruct((B, R), jnp.float32),
        grid_spec=pltpu.PrefetchScalarGridSpec(
            num_scalar_prefetch=0,
            grid=(nk,),
            in_specs=[
                pl.BlockSpec((B, tk), lambda k: (0, k)),
                pl.BlockSpec((R, tk), lambda k: (0, k)),
                pl.BlockSpec((B, R), lambda k: (0, 0)),
            ],
            out_specs=pl.BlockSpec((B, R), lambda k: (0, 0)),
            scratch_shapes=[pltpu.VMEM((B, R), jnp.float32)],
        ),
        compiler_params=pltpu.CompilerParams(
            dimension_semantics=("arbitrary",)),
    )(x_flat, a_t, bias_plus_gumbel)


# ----------------------------------------------------------------------------
# One-time weight preparation (weights are static at inference):
#   conv(1x1) followed by fc is a single affine map on the NCHW-flattened input:
#     logits[b, r] = sum_{c,h,w} x[b,c,h,w] * A_T[r, c*HW + hW + w] + c_eff[r]
#   A_T[r, c*HW + p] = sum_o fc_w[r, o*HW + p] * conv_w[o, c]
#   c_eff[r]        = sum_{o,p} fc_w[r, o*HW + p] * conv_b[o] + fc_b[r]
# ----------------------------------------------------------------------------
def fold_gating_params(conv_w, conv_b, fc_w, fc_b, H, W):
    c_out, c_in = conv_w.shape[0], conv_w.shape[1]
    hw = H * W
    w1 = conv_w.reshape(c_out, c_in).astype(jnp.float32)                 # (128, C)
    fc_w3 = fc_w.reshape(fc_w.shape[0], c_out, hw).astype(jnp.float32)   # (R,128,HW)
    a_t = jnp.einsum("rop,oc->rcp", fc_w3, w1,
                     precision=lax.Precision.HIGHEST).reshape(fc_w.shape[0],
                                                              c_in * hw)
    c_eff = jnp.einsum("rop,o->r", fc_w3, conv_b.astype(jnp.float32),
                       precision=lax.Precision.HIGHEST) + fc_b
    return a_t, c_eff


def gating_network_forward(x_nchw, folded_params, gumbel_noise, *, tau=1.0,
                           max_block_k=32768):
    a_t, c_eff = folded_params
    B = x_nchw.shape[0]
    x_flat = x_nchw.reshape(B, -1)                     # NCHW flatten: no transpose
    bias_plus_gumbel = c_eff[None, :] + gumbel_noise   # fold bias + noise once
    return gating_logits_gumbel(x_flat, a_t, bias_plus_gumbel, tau=tau,
                                max_block_k=max_block_k)


# ----------------------------------------------------------------------------
# Pure-JAX reference (faithful, unfolded module math)
# ----------------------------------------------------------------------------
def _reference_forward(x_nchw, params, gumbel_noise, *, tau=1.0):
    conv_w, conv_b, fc_w, fc_b = params
    B, C, H, W = x_nchw.shape
    y = jnp.einsum("bchw,oc->bohw", x_nchw, conv_w.reshape(conv_w.shape[0], C),
                   precision=lax.Precision.HIGHEST)
    y = y + conv_b[None, :, None, None]
    y = y.reshape(B, -1)
    logits = jnp.einsum("bn,rn->br", y, fc_w,
                        precision=lax.Precision.HIGHEST) + fc_b
    z = (logits + gumbel_noise) / tau
    soft = jax.nn.softmax(z, axis=-1)
    hard = jax.nn.one_hot(jnp.argmax(soft, axis=-1), soft.shape[-1],
                          dtype=soft.dtype)
    return hard - soft + soft


if __name__ == "__main__":
    # small shapes consistent with the module
    B, C, H, W = 2, 4, 16, 16
    C_OUT = 128                        # first_conv out channels (fixed in module)
    NUM_RSACM = 8                      # args.number_of_rsacm
    NEURONS_FC = C_OUT * H * W         # 128*16*16 = 32768

    key = jax.random.PRNGKey(0)
    kx, kcw, kcb, kfw, kfb, kg = jax.random.split(key, 6)

    x = jax.random.normal(kx, (B, C, H, W), dtype=jnp.float32)

    # deterministic PyTorch-style uniform init
    bc = 1.0 / math.sqrt(C * 1 * 1)
    conv_w = jax.random.uniform(kcw, (C_OUT, C, 1, 1), jnp.float32, -bc, bc)
    conv_b = jax.random.uniform(kcb, (C_OUT,), jnp.float32, -bc, bc)
    bf = 1.0 / math.sqrt(NEURONS_FC)
    fc_w = jax.random.uniform(kfw, (NUM_RSACM, NEURONS_FC), jnp.float32, -bf, bf)
    fc_b = jax.random.uniform(kfb, (NUM_RSACM,), jnp.float32, -bf, bf)

    # standard Gumbel noise (same role as the noise torch gumbel_softmax samples)
    gumbel_noise = jax.random.gumbel(kg, (B, NUM_RSACM), dtype=jnp.float32)

    params = (conv_w, conv_b, fc_w, fc_b)
    folded = fold_gating_params(conv_w, conv_b, fc_w, fc_b, H, W)
    ref = _reference_forward(x, params, gumbel_noise, tau=1.0)

    # 1) default path: K = C*H*W = 1024 fits in one block -> grid=(1,)
    out = gating_network_forward(x, folded, gumbel_noise, tau=1.0)
    out = jax.block_until_ready(out)
    assert out.shape == (B, NUM_RSACM)
    assert jnp.allclose(jnp.sum(out, axis=-1), 1.0, atol=1e-5)
    assert jnp.allclose(out, ref, atol=1e-4), (out, ref)

    # 2) tiled path: force tk=256 -> grid=(4,) K-accumulation, same result
    out_tiled = gating_network_forward(x, folded, gumbel_noise, tau=1.0,
                                       max_block_k=256)
    out_tiled = jax.block_until_ready(out_tiled)
    assert jnp.allclose(out_tiled, ref, atol=1e-4), (out_tiled, ref)

    print("KERNEL_OK")
</pallas_src>

<mosaic_0001>
module attributes {stable_mosaic.version = 11 : i64} {
  func.func @_gating_kernel(%arg0: i32, %arg1: memref<2x1024xf32, #tpu.memory_space<vmem>>, %arg2: memref<8x1024xf32, #tpu.memory_space<vmem>>, %arg3: memref<2x8xf32, #tpu.memory_space<vmem>>, %arg4: memref<2x8xf32, #tpu.memory_space<vmem>>, %arg5: memref<2x8xf32, #tpu.memory_space<vmem>>) attributes {dimension_semantics = [#tpu.dimension_semantics<arbitrary>], iteration_bounds = array<i64: 1>, scalar_prefetch = 0 : i64, scratch_operands = 1 : i64, tpu.core_type = #tpu.core_type<tc>, window_params = [{transform_indices = @transform_0, window_bounds = array<i64: 2, 1024>}, {transform_indices = @transform_1, window_bounds = array<i64: 8, 1024>}, {pipeline_mode = #tpu.pipeline_mode<synchronous>, transform_indices = @transform_2, window_bounds = array<i64: 2, 8>}, {pipeline_mode = #tpu.pipeline_mode<synchronous>, transform_indices = @transform_3, window_bounds = array<i64: 2, 8>}]} {
    %c0_i32 = arith.constant 0 : i32
    %0 = arith.cmpi eq, %arg0, %c0_i32 : i32
    %1 = arith.extui %0 : i1 to i32
    %c0_i32_0 = arith.constant 0 : i32
    %2 = arith.cmpi ne, %1, %c0_i32_0 : i32
    scf.if %2 {
      %cst_10 = arith.constant 0.000000e+00 : f32
      %12 = vector.broadcast %cst_10 : f32 to vector<2x8xf32>
      %c0_11 = arith.constant 0 : index
      %c0_12 = arith.constant 0 : index
      %13 = vector.load %arg5[%c0_11, %c0_12] : memref<2x8xf32, #tpu.memory_space<vmem>>, vector<2x8xf32>
      tpu.vector_store %arg5[%c0_11, %c0_12], %12 {strides = array<i32>} : memref<2x8xf32, #tpu.memory_space<vmem>>, vector<2x8xf32>,
    } else {
    }
    %c0 = arith.constant 0 : index
    %c0_1 = arith.constant 0 : index
    %3 = vector.load %arg5[%c0, %c0_1] : memref<2x8xf32, #tpu.memory_space<vmem>>, vector<2x8xf32>
    %c0_2 = arith.constant 0 : index
    %c0_3 = arith.constant 0 : index
    %4 = vector.load %arg1[%c0_2, %c0_3] : memref<2x1024xf32, #tpu.memory_space<vmem>>, vector<2x1024xf32>
    %c0_4 = arith.constant 0 : index
    %c0_5 = arith.constant 0 : index
    %5 = vector.load %arg2[%c0_4, %c0_5] : memref<8x1024xf32, #tpu.memory_space<vmem>>, vector<8x1024xf32>
    %cst = arith.constant dense<0.000000e+00> : vector<2x8xf32>
    %6 = tpu.matmul %4, %5, %cst {dimension_numbers = #tpu.dot_dimension_numbers<[1], [1], [0], [0], [0, 0, 1, 0], [], []>} : vector<2x1024xf32>, vector<8x1024xf32>, vector<2x8xf32> -> vector<2x8xf32>
    %7 = arith.addf %3, %6 : vector<2x8xf32>
    %c0_6 = arith.constant 0 : index
    %c0_7 = arith.constant 0 : index
    %8 = vector.load %arg5[%c0_6, %c0_7] : memref<2x8xf32, #tpu.memory_space<vmem>>, vector<2x8xf32>
    tpu.vector_store %arg5[%c0_6, %c0_7], %7 {strides = array<i32>} : memref<2x8xf32, #tpu.memory_space<vmem>>, vector<2x8xf32>,
    %c0_i32_8 = arith.constant 0 : i32
    %9 = arith.cmpi eq, %arg0, %c0_i32_8 : i32
    %10 = arith.extui %9 : i1 to i32
    %c0_i32_9 = arith.constant 0 : i32
    %11 = arith.cmpi ne, %10, %c0_i32_9 : i32
    scf.if %11 {
      %c0_10 = arith.constant 0 : index
      %c0_11 = arith.constant 0 : index
      %12 = vector.load %arg5[%c0_10, %c0_11] : memref<2x8xf32, #tpu.memory_space<vmem>>, vector<2x8xf32>
      %c0_12 = arith.constant 0 : index
      %c0_13 = arith.constant 0 : index
      %13 = vector.load %arg3[%c0_12, %c0_13] : memref<2x8xf32, #tpu.memory_space<vmem>>, vector<2x8xf32>
      %14 = arith.addf %12, %13 : vector<2x8xf32>
      %cst_14 = arith.constant 1.000000e+00 : f32
      %15 = vector.broadcast %cst_14 : f32 to vector<2x8xf32>
      %16 = arith.mulf %14, %15 : vector<2x8xf32>
      %cst_15 = arith.constant dense<0xFF800000> : vector<2xf32>
      %17 = vector.multi_reduction <maximumf>, %16, %cst_15 [1] : vector<2x8xf32> to vector<2xf32>
      %18 = vector.shape_cast %17 : vector<2xf32> to vector<2x1xf32>
      %19 = vector.broadcast %18 : vector<2x1xf32> to vector<2x8xf32>
      %20 = arith.subf %16, %19 : vector<2x8xf32>
      %21 = math.exp %20 : vector<2x8xf32>
      %cst_16 = arith.constant dense<0.000000e+00> : vector<2xf32>
      %22 = vector.multi_reduction <add>, %21, %cst_16 [1] : vector<2x8xf32> to vector<2xf32>
      %23 = vector.shape_cast %22 : vector<2xf32> to vector<2x1xf32>
      %24 = tpu.reciprocal %23 {approx = true} : vector<2x1xf32> -> vector<2x1xf32>
      %25 = vector.broadcast %24 : vector<2x1xf32> to vector<2x8xf32>
      %26 = arith.mulf %21, %25 : vector<2x8xf32>
      %27 = tpu.iota {dimensions = array<i32: 1>} : vector<2x8xi32>
      %28 = vector.broadcast %18 : vector<2x1xf32> to vector<2x8xf32>
      %29 = arith.cmpf oeq, %16, %28 : vector<2x8xf32>
      %c8_i32 = arith.constant 8 : i32
      %30 = vector.broadcast %c8_i32 : i32 to vector<2x8xi32>
      %31 = arith.select %29, %27, %30 : vector<2x8xi1>, vector<2x8xi32>
      %cst_17 = arith.constant dense<2147483647> : vector<2xi32>
      %32 = vector.multi_reduction <minsi>, %31, %cst_17 [1] : vector<2x8xi32> to vector<2xi32>
      %33 = vector.shape_cast %32 : vector<2xi32> to vector<2x1xi32>
      %34 = vector.broadcast %33 : vector<2x1xi32> to vector<2x8xi32>
      %35 = arith.cmpi eq, %27, %34 : vector<2x8xi32>
      %36 = arith.extui %35 : vector<2x8xi1> to vector<2x8xi32>
      %37 = arith.sitofp %36 : vector<2x8xi32> to vector<2x8xf32>
      %38 = arith.subf %37, %26 : vector<2x8xf32>
      %39 = arith.addf %38, %26 : vector<2x8xf32>
      %c0_18 = arith.constant 0 : index
      %c0_19 = arith.constant 0 : index
      %40 = vector.load %arg4[%c0_18, %c0_19] : memref<2x8xf32, #tpu.memory_space<vmem>>, vector<2x8xf32>
      tpu.vector_store %arg4[%c0_18, %c0_19], %39 {strides = array<i32>} : memref<2x8xf32, #tpu.memory_space<vmem>>, vector<2x8xf32>,
    } else {
    }
    return
  }
  func.func @transform_0(%arg0: i32) -> (i32, i32) {
    %c0_i32 = arith.constant 0 : i32
    %c0_i32_0 = arith.constant 0 : i32
    return %c0_i32, %arg0 : i32, i32
  }
  func.func @transform_1(%arg0: i32) -> (i32, i32) {
    %c0_i32 = arith.constant 0 : i32
    %c0_i32_0 = arith.constant 0 : i32
    return %c0_i32, %arg0 : i32, i32
  }
  func.func @transform_2(%arg0: i32) -> (i32, i32) {
    %c0_i32 = arith.constant 0 : i32
    %c0_i32_0 = arith.constant 0 : i32
    %c0_i32_1 = arith.constant 0 : i32
    return %c0_i32, %c0_i32_0 : i32, i32
  }
  func.func @transform_3(%arg0: i32) -> (i32, i32) {
    %c0_i32 = arith.constant 0 : i32
    %c0_i32_0 = arith.constant 0 : i32
    %c0_i32_1 = arith.constant 0 : i32
    return %c0_i32, %c0_i32_0 : i32, i32
  }
}

</mosaic_0001>

<bundles_post_ra>
// kernel: tpu_custom_call.1
= control target key start
LH: loop header
LB: loop body
LE: loop exit
PB: predicated region body
PF: predicated region fallthrough
CT: control target
= control target key end

     0   :  { %8 = vsyncpa [#allocation4], 0  ;;  %s472_s0 = inlined_call_operand.hbm [shape: f32[2,1024], index: 0, kind: input, shape index: {}]   ;;  %s473_s1 = inlined_call_operand.hbm [shape: f32[8,1024], index: 1, kind: input, shape index: {}]   ;;  %s474_s2 = inlined_call_operand.hbm [shape: f32[2,8], index: 2, kind: input, shape index: {}]   ;;  %s475_s3 = inlined_call_operand.hbm [shape: f32[2,8], index: 3, kind: output, shape index: {}]  }
   0x1   :  { %9 = vsyncpa [#allocation7], 0  ;;  %s27_s14 = sshll.u32 %s473_s1, 4  ;;  %s28_s14 = int_to_ptr.hbm [resolvable:$true] %s27_s14 }
   0x2   :  { %10 = vsyncpa [#allocation5], 0  ;;  %s429_s15 = smov [#allocation6]   ;;  %s16_s19 = sshll.u32 %s472_s0, 4  ;;  %s17_s19 = int_to_ptr.hbm [resolvable:$true] %s16_s19 }
   0x3   :  { %s29_s16 = sshll.u32 %s429_s15, 4  ;;  %s430_s20 = smov [#allocation3]   ;;  %s30_s16 = int_to_ptr.vmem [resolvable:$true] %s29_s16 }
   0x4   :  { %32 = dma.hbm_to_vmem [thread:$0]  %s28_s14, 1024, %s30_s16, [#allocation7]  }
   0x5   :  { %s18_s21 = sshll.u32 %s430_s20, 4  ;;  %s38_s24 = sshll.u32 %s474_s2, 4  ;;  %s19_s21 = int_to_ptr.vmem [resolvable:$true] %s18_s21  ;;  %s39_s24 = int_to_ptr.hbm [resolvable:$true] %s38_s24 }
   0x6   :  { %21 = dma.hbm_to_vmem [thread:$0]  %s17_s19, 256, %s19_s21, [#allocation4]  }
   0x7   :  { %s431_s1 = smov [#allocation8]  }
   0x8   :  { %s40_s25 = sshll.u32 %s431_s1, 4  ;;  %s41_s25 = int_to_ptr.vmem [resolvable:$true] %s40_s25 }
   0x9   :  { %43 = dma.hbm_to_vmem [thread:$0]  %s39_s24, 32, %s41_s25, [#allocation7]  }
   0xa   :  { %423 = dma.done.wait [#allocation4], 256  }
   0xb   :  { %424 = vsyncadd [#allocation4], 4294967040 }
   0xc   :  { %425 = dma.done.wait [#allocation7], 1056  }
   0xd   :  { %426 = vsyncadd [#allocation7], 4294966240  ;;  %v67_v0 = vld [vmem:[#allocation6 + $0x10] sm:$0xff]  ;;  %v65_v1 = vld [vmem:[#allocation6] sm:$0xff]  ;;  %vm60_vm0 = vcmask 58368   ;;  %v432_v18 = vmov 0.0   ;;  %v274_v40 = vlaneseq }
   0xe   :  { %v66_v2 = vld [vmem:[#allocation6 + $0x8] sm:$0xff]  ;;  %149 = vmatpush.xpose.msra.mxu2 %v67_v0  ;;  %109 = vmatpush.xpose.msra.mxu0 %v65_v1  ;;  %v68_v3 = vld [vmem:[#allocation6 + $0x18] sm:$0xff]  ;;  %v63_v4 = vld [vmem:[#allocation3] sm:$0xff]  ;;  %61 = vst.msk [vmem:[#allocation2] sm:$0x3] %vm60_vm0, %v432_v18  ;;  %s433_s0 = smov [#allocation9]  }
   0xf   :  { %v71_v5 = vld [vmem:[#allocation6 + $0x30] sm:$0xff]  ;;  %129 = vmatpush.xpose.msra.mxu1 %v66_v2  ;;  %169 = vmatpush.xpose.msra.mxu3 %v68_v3  ;;  %75 = vst [vmem:[#allocation1] ss:$4 sm:$0xff] %v63_v4  ;;  %v69_v6 = vld [vmem:[#allocation6 + $0x20] sm:$0xff]  ;;  %v72_v7 = vld [vmem:[#allocation6 + $0x38] sm:$0xff]  ;;  %v275_v41 = vand.u32 127, %v274_v40 }
  0x10   :  { %v70_v8 = vld [vmem:[#allocation6 + $0x28] sm:$0xff]  ;;  %v64_v9 = vld [vmem:[#allocation3 + $0x8] sm:$0xff]  ;;  %v261_v36 = vld [vmem:[#allocation8] sm:$0x3]  ;;  %s304_s2 = sshll.u32 %s433_s0, 4  ;;  %s306_s28 = sshll.u32 %s475_s3, 4  ;;  %s305_s2 = int_to_ptr.vmem [resolvable:$true] %s304_s2  ;;  %s307_s28 = int_to_ptr.hbm [resolvable:$true] %s306_s28 }
  0x11   :  { %77 = vst [vmem:[#allocation1 + $0x20] ss:$4 sm:$0xff] %v64_v9 }
  0x12   :  { %229 = vmatpush.xpose.msrb.mxu2 %v71_v5  ;;  %189 = vmatpush.xpose.msrb.mxu0 %v69_v6 }
  0x13   :  { %249 = vmatpush.xpose.msrb.mxu3 %v72_v7  ;;  %209 = vmatpush.xpose.msrb.mxu1 %v70_v8 }
  0x15   :  { %v62_v33 = vld [vmem:[#allocation2] sm:$0x3] }
  0x16   :  { %v80_v10 = vld.sshfl [vmem:[#allocation1 + $0x10] sm:$0xff pattern:$0x73625140]  ;;  %v78_v11 = vld.sshfl [vmem:[#allocation1] sm:$0xff pattern:$0x73625140] }
  0x17   :  { %150 = vmatmul.f32.vlgmr.msra.gmra.mxu2 %v80_v10  ;;  %110 = vmatmul.f32.vlgmr.msra.gmra.mxu0 %v78_v11  ;;  %v79_v12 = vld.sshfl [vmem:[#allocation1 + $0x8] sm:$0xff pattern:$0x73625140]  ;;  %v81_v13 = vld.sshfl [vmem:[#allocation1 + $0x18] sm:$0xff pattern:$0x73625140] }
  0x18   :  { %130 = vmatmul.f32.vlgmr.msra.gmra.mxu1 %v79_v12  ;;  %170 = vmatmul.f32.vlgmr.msra.gmra.mxu3 %v81_v13  ;;  %v84_v14 = vld.sshfl [vmem:[#allocation1 + $0x30] sm:$0xff pattern:$0x73625140]  ;;  %v82_v15 = vld.sshfl [vmem:[#allocation1 + $0x20] sm:$0xff pattern:$0x73625140] }
  0x19   :  { %v85_v16 = vld.sshfl [vmem:[#allocation1 + $0x38] sm:$0xff pattern:$0x73625140]  ;;  %v83_v17 = vld.sshfl [vmem:[#allocation1 + $0x28] sm:$0xff pattern:$0x73625140] }
  0x1f   :  { %230 = vmatmul.f32.vlgmr.msrb.gmra.mxu2 %v84_v14  ;;  %190 = vmatmul.f32.vlgmr.msrb.gmra.mxu0 %v82_v15 }
  0x20   :  { %250 = vmatmul.f32.vlgmr.msrb.gmra.mxu3 %v85_v16  ;;  %210 = vmatmul.f32.vlgmr.msrb.gmra.mxu1 %v83_v17 }
  0x94   :  { %v111_v19 = vpop.f32.mrf.mxu0 }
  0x95   :  { %v131_v20 = vpop.f32.mrf.mxu1 }
  0x96   :  { %v132_v21 = vadd.f32 %v131_v20, %v111_v19 }
  0x9a   :  { %v151_v22 = vpop.f32.mrf.mxu2 }
  0x9b   :  { %v152_v23 = vadd.f32 %v151_v22, %v132_v21  ;;  %v171_v24 = vpop.f32.mrf.mxu3 }
  0x9c   :  { %v191_v25 = vpop.f32.mrf.mxu0 }
  0x9d   :  { %v172_v26 = vadd.f32 %v171_v24, %v152_v23  ;;  %v211_v27 = vpop.f32.mrf.mxu1 }
  0x9f   :  { %v192_v28 = vadd.f32 %v191_v25, %v172_v26 }
  0xa1   :  { %v212_v29 = vadd.f32 %v211_v27, %v192_v28 }
  0xa2   :  { %v231_v30 = vpop.f32.mrf.mxu2 }
  0xa3   :  { %v232_v31 = vadd.f32 %v231_v30, %v212_v29  ;;  %v251_v32 = vpop.f32.mrf.mxu3 }
  0xa5   :  { %v252_v34 = vadd.f32 %v251_v32, %v232_v31 }
  0xa7   :  { %v254_v35 = vadd.f32 %v252_v34, %v62_v33 }
  0xa9   :  { %256 = vst.msk [vmem:[#allocation2] sm:$0x3] %vm60_vm0, %v254_v35 }
  0xb0   :  { %v260_v37 = vld [vmem:[#allocation2] sm:$0x3] }
  0xb1   :  { %v262_v38 = vadd.f32 %v261_v36, %v260_v37 }
  0xb3   :  { %v263_v39 = vsel %vm60_vm0, %v262_v38, -inf }
  0xb4   :  { %264 = vmax.xlane.f32.xlu0 %v263_v39 }
 0x127   :  { %v265_v42 = vpop.xlane.xlu0 %264 }
 0x128   :  { %v266_v43 = vsub.f32 %v262_v38, %v265_v42  ;;  %vm276_vm1 = vcmp.eq.f32.partialorder %v262_v38, %v265_v42 }
 0x129   :  { %v277_v44 = vsel %vm276_vm1, %v275_v41, 8 }
 0x12a   :  { %v267_v45 = vmul.f32 1.442695, %v266_v43  ;;  %v278_v46 = vsel %vm60_vm0, %v277_v44, 2147483647 }
 0x12b   :  { %v280_v47 = vshra.s32 %v278_v46, 16  ;;  %v279_v51 = vand.u32 65535, %v278_v46 }
 0x12c   :  { %323 = vpow2.f32 %v267_v45 }
 0x12d   :  { %v282_v48 = vcvt.s32.f32 %v280_v47  ;;  %v281_v53 = vcvt.s32.f32 %v279_v51 }
 0x12f   :  { %283 = vmin.xlane.f32.xlu0 %v282_v48 }
 0x132   :  { %v324_v49 = vpop.eup %323 }
 0x133   :  { %v269_v50 = vsel %vm60_vm0, %v324_v49, 0.0 }
 0x134   :  { %270 = vadd.xlane.f32.xlu1 %v269_v50 }
 0x1a2   :  { %v284_v52 = vpop.xlane.xlu0 %283 }
 0x1a3   :  { %vm285_vm2 = vcmp.eq.f32.partialorder %v282_v48, %v284_v52  ;;  %v290_v56 = vcvt.f32.s32 %v284_v52 }
 0x1a4   :  { %v286_v54 = vsel %vm285_vm2, %v281_v53, inf }
 0x1a5   :  { %287 = vmin.xlane.f32.xlu1 %v286_v54  ;;  %v291_v58 = vshll.u32 %v290_v56, 16 }
 0x1a7   :  { %v271_v55 = vpop.xlane.xlu1 %270 }
 0x1a8   :  { %325 = vrcp.f32 %v271_v55 }
 0x1ae   :  { %v326_v60 = vpop.eup %325 }
 0x1af   :  { %v273_v62 = vmul.f32 %v326_v60, %v324_v49 }
 0x218   :  { %v288_v57 = vpop.xlane.xlu1 %287 }
 0x219   :  { %v289_v59 = vcvt.f32.s32 %v288_v57 }
 0x21b   :  { %v292_v61 = vadd.s32 %v291_v58, %v289_v59 }
 0x21d   :  { %vm293_vm3 = vcmp.eq.s32.totalorder %v275_v41, %v292_v61 }
 0x21e   :  { %v317_v63 = vsel %vm293_vm3, 1.0, %v432_v18 }
 0x21f   :  { %v296_v0 = vsub.f32 %v317_v63, %v273_v62 }
 0x221   :  { %v297_v1 = vadd.f32 %v296_v0, %v273_v62 }
 0x223   :  { %298 = vst.msk [vmem:[#allocation9] sm:$0x3] %vm60_vm0, %v297_v1 }
 0x224   :  { %309 = dma.vmem_to_hbm [thread:$0]  %s305_s2, 32, %s307_s28, [#allocation5]  }
 0x225   :  { %427 = dma.done.wait [#allocation5], 32  }
 0x226   :  { %428 = vsyncadd [#allocation5], 4294967264 }
 0x227   :  { %314 = vsyncpa [#allocation4], 1 }
 0x228   :  { %315 = vsyncpa [#allocation7], 1 }
 0x229   :  { %316 = vsyncpa [#allocation5], 1 }

</bundles_post_ra>
